<compile_context>
chip_gen: v7x
topology: tpu7x:2x2x1
jax: 0.10.0
libtpu: 0.0.40
codegen_flags: <defaults>
</compile_context>

<pallas_src>
import functools

import jax
import jax.numpy as jnp
from jax.experimental import pallas as pl
from jax.experimental.pallas import tpu as pltpu


def _round_up(x, m):
    return ((x + m - 1) // m) * m


def _pick_tile_n(n, d_in, cn_pad, d_model, cdt_bytes, l_bytes, want):
    """Largest instance tile (multiple of 128) s.t. double-buffered feats + L
    tiles plus resident weights/scratch fit a ~32 MiB budget (v7x-safe)."""
    budget = 32 << 20
    fixed = 2 * cdt_bytes * (cn_pad * d_in + d_in * d_model
                             + d_model * d_model + 2 * d_model)   # resident inputs (x2 buf)
    fixed += 4 * (cn_pad * d_model + 2 * cn_pad + cn_pad * d_in)  # f32 scratch
    fixed += 2 * 4 * (cn_pad + cn_pad * d_in)                     # z / B outputs (x2 buf)
    tile = max(128, min(_round_up(want, 128), _round_up(n, 128)))
    while tile > 128:
        per_step = 2 * tile * d_in * cdt_bytes + 2 * cn_pad * tile * l_bytes
        if fixed + per_step <= budget:
            break
        tile -= 128
    return tile


def _attend_pool_kernel(feats_ref, mfeats_ref, w1_ref, b1_ref, w2_ref, b2_ref,
                        l_ref, z_ref, b_ref,
                        qmax_sc, m_sc, s_sc, acc_sc,
                        *, n_valid, inv_sqrt_d, mask_last):
    """Gridded over instance tiles: q-net, lane-dense [C, tile] logits, online
    softmax (flash-style), attention pooling B = softmax(L) @ feats."""
    t = pl.program_id(0)
    cdt = feats_ref.dtype                      # MXU operand dtype (bf16 / f32)
    tn = feats_ref.shape[0]

    def q_net(x):
        # Linear -> ReLU -> Linear -> Tanh, f32 accumulation / activations.
        h = jnp.dot(x, w1_ref[...], preferred_element_type=jnp.float32) + b1_ref[...]
        h = jnp.maximum(h, 0.0).astype(cdt)
        h = jnp.dot(h, w2_ref[...], preferred_element_type=jnp.float32) + b2_ref[...]
        return jnp.tanh(h)                     # f32

    @pl.when(t == 0)
    def _():
        # q_net(m_feats) computed once, cached, with 1/sqrt(d) pre-folded.
        qmax_sc[...] = q_net(mfeats_ref[...]) * inv_sqrt_d
        m_sc[...] = jnp.full_like(m_sc, -jnp.inf)
        s_sc[...] = jnp.zeros_like(s_sc)
        acc_sc[...] = jnp.zeros_like(acc_sc)

    feats_t = feats_ref[...]                   # [tn, D_in] (compute dtype)
    q_t = q_net(feats_t).astype(cdt)           # [tn, d]
    q_max = qmax_sc[...].astype(cdt)           # [Cp, d] (already scaled)

    # Lane-dense [Cp, tn] scaled logits via NT dot_general (contract d axes).
    logits = jax.lax.dot_general(
        q_max, q_t, (((1,), (1,)), ((), ())),
        preferred_element_type=jnp.float32)

    if mask_last:
        # Zero-padded instance columns -> -inf so they vanish from the softmax.
        col = t * tn + jax.lax.broadcasted_iota(jnp.int32, logits.shape, 1)
        logits = jnp.where(col < n_valid, logits, -jnp.inf)

    l_ref[...] = logits.astype(l_ref.dtype)    # scaled-logit tile -> HBM

    # Online (flash-style) softmax statistics over the instance (lane) axis.
    m_prev = m_sc[...]                                              # [Cp, 1]
    m_new = jnp.maximum(m_prev, jnp.max(logits, axis=-1, keepdims=True))
    alpha = jnp.exp(m_prev - m_new)                                 # [Cp, 1]
    p = jnp.exp(logits - m_new)                                     # [Cp, tn]
    s_sc[...] = alpha * s_sc[...] + jnp.sum(p, axis=-1, keepdims=True)
    acc_sc[...] = alpha * acc_sc[...] + jnp.dot(
        p.astype(cdt), feats_t, preferred_element_type=jnp.float32)  # [Cp, D_in]
    m_sc[...] = m_new

    @pl.when(t == pl.num_programs(0) - 1)
    def _():
        s = s_sc[...]                          # [Cp, 1]
        b_ref[...] = acc_sc[...] / s           # [Cp, D_in] = softmax(L) @ feats
        # log-sum-exp shift: wrapper computes A = exp(L - z).
        z_ref[...] = m_sc[...] + jnp.log(s)


def bclassifier_forward(feats, c, params, compute_dtype=jnp.bfloat16, tile_n=None):
    N, D_in = feats.shape
    Cn = params["fcc_w"].shape[0]
    d_model = params["w1"].shape[1]
    Cn_pad = _round_up(Cn, 8)                  # sublane-dense class axis

    cdt = jnp.dtype(compute_dtype)
    # bf16 logits only on the bf16 path; exactness path keeps f32 intermediates.
    l_dtype = jnp.float32 if cdt == jnp.dtype(jnp.float32) else cdt

    # Glue: torch.sort(c, 0, descending=True)[1][0, :] == argmax over axis 0.
    m_idx = jnp.argmax(c, axis=0)                          # [C]
    m_feats = jnp.take(feats, m_idx, axis=0)               # [C, D_in]
    if Cn_pad != Cn:
        m_feats = jnp.pad(m_feats, ((0, Cn_pad - Cn), (0, 0)))

    want = 1024 if tile_n is None else tile_n
    tn = _pick_tile_n(N, D_in, Cn_pad, d_model,
                      cdt.itemsize, jnp.dtype(l_dtype).itemsize, want)
    N_pad = _round_up(N, tn)
    num_tiles = N_pad // tn

    feats_c = feats.astype(cdt)
    if N_pad != N:
        feats_c = jnp.pad(feats_c, ((0, N_pad - N), (0, 0)))
    m_feats_c = m_feats.astype(cdt)
    w1 = params["w1"].astype(cdt)
    w2 = params["w2"].astype(cdt)
    b1 = params["b1"].astype(jnp.float32)
    b2 = params["b2"].astype(jnp.float32)

    kernel = functools.partial(
        _attend_pool_kernel,
        n_valid=N,
        inv_sqrt_d=float(d_model) ** -0.5,     # compile-time constant
        mask_last=(N_pad != N))

    in_specs = [
        pl.BlockSpec((tn, D_in), lambda t: (t, 0)),        # feats (streamed)
        pl.BlockSpec((Cn_pad, D_in), lambda t: (0, 0)),    # m_feats (resident)
        pl.BlockSpec((D_in, d_model), lambda t: (0, 0)),   # w1
        pl.BlockSpec((1, d_model), lambda t: (0, 0)),      # b1
        pl.BlockSpec((d_model, d_model), lambda t: (0, 0)),  # w2
        pl.BlockSpec((1, d_model), lambda t: (0, 0)),      # b2
    ]
    out_shapes = (
        jax.ShapeDtypeStruct((Cn_pad, N_pad), l_dtype),    # L: scaled logits
        jax.ShapeDtypeStruct((Cn_pad, 1), jnp.float32),    # z = m + log(sum exp)
        jax.ShapeDtypeStruct((Cn_pad, D_in), jnp.float32),  # B (bag features)
    )
    out_specs = (
        pl.BlockSpec((Cn_pad, tn), lambda t: (0, t)),
        pl.BlockSpec((Cn_pad, 1), lambda t: (0, 0)),
        pl.BlockSpec((Cn_pad, D_in), lambda t: (0, 0)),
    )
    scratch_shapes = [
        pltpu.VMEM((Cn_pad, d_model), jnp.float32),        # cached scaled q_net(m_feats)
        pltpu.VMEM((Cn_pad, 1), jnp.float32),              # running max
        pltpu.VMEM((Cn_pad, 1), jnp.float32),              # running exp-sum
        pltpu.VMEM((Cn_pad, D_in), jnp.float32),           # running B accumulator
    ]

    L_out, z_out, B_out = pl.pallas_call(
        kernel,
        out_shape=out_shapes,
        grid_spec=pltpu.PrefetchScalarGridSpec(
            num_scalar_prefetch=0,
            grid=(num_tiles,),
            in_specs=in_specs,
            out_specs=out_specs,
            scratch_shapes=scratch_shapes),
        compiler_params=pltpu.CompilerParams(
            dimension_semantics=("arbitrary",),            # N is a reduction axis
            vmem_limit_bytes=48 * 1024 * 1024),
    )(feats_c, m_feats_c, w1, b1, w2, b2)

    # Epilogue in plain JAX (fused by XLA): slice off padding, normalize, conv.
    L = L_out[:Cn, :N].astype(jnp.float32)                 # [C, N]
    z = z_out[:Cn]                                         # [C, 1]
    A = jnp.exp(L - z).T                                   # [N, C] softmax over instances
    Bmat = B_out[:Cn]                                      # [C, D_in]
    C_out = (jnp.einsum("oik,ik->o", params["fcc_w"].astype(jnp.float32), Bmat)
             + params["fcc_b"][:, 0].astype(jnp.float32)).reshape(1, Cn)
    B = Bmat.reshape(1, Cn, D_in)
    return C_out, A, B


def reference_forward(feats, c, params):
    """Pure-JAX f32 reference mirroring the PyTorch module
    (nonlinear=True, passing_v=False)."""
    def q_net(x):
        h = jnp.maximum(x @ params["w1"] + params["b1"], 0.0)
        return jnp.tanh(h @ params["w2"] + params["b2"])

    V = feats
    Q = q_net(feats)
    m_idx = jnp.argmax(c, axis=0)
    m_feats = feats[m_idx]
    q_max = q_net(m_feats)
    A = Q @ q_max.T
    A = jax.nn.softmax(A / jnp.sqrt(jnp.float32(Q.shape[1])), axis=0)
    B = A.T @ V
    C = jnp.einsum("oik,ik->o", params["fcc_w"], B) + params["fcc_b"][:, 0]
    return C.reshape(1, -1), A, B.reshape(1, *B.shape)


def make_params(key, input_size, d_model, output_class):
    ks = jax.random.split(key, 6)
    s = 0.1
    return {
        "w1": (s * jax.random.normal(ks[0], (input_size, d_model))).astype(jnp.float32),
        "b1": (s * jax.random.normal(ks[1], (1, d_model))).astype(jnp.float32),
        "w2": (s * jax.random.normal(ks[2], (d_model, d_model))).astype(jnp.float32),
        "b2": (s * jax.random.normal(ks[3], (1, d_model))).astype(jnp.float32),
        # Conv1d weight [C_out, C_in, K=input_size], bias kept as a column.
        "fcc_w": (s * jax.random.normal(ks[4], (output_class, output_class, input_size))).astype(jnp.float32),
        "fcc_b": (s * jax.random.normal(ks[5], (output_class, 1))).astype(jnp.float32),
    }


if __name__ == "__main__":
    N, input_size, d_model, output_class = 256, 64, 32, 4

    key = jax.random.PRNGKey(0)
    k_feats, k_c, k_params = jax.random.split(key, 3)
    feats = jax.random.normal(k_feats, (N, input_size), dtype=jnp.float32)
    c = jax.random.normal(k_c, (N, output_class), dtype=jnp.float32)
    params = make_params(k_params, input_size, d_model, output_class)

    C_ref, A_ref, B_ref = reference_forward(feats, c, params)

    # Performance path: bf16 MXU operands / bf16 logits, f32 accumulation.
    C_bf, A_bf, B_bf = bclassifier_forward(feats, c, params,
                                           compute_dtype=jnp.bfloat16)
    jax.block_until_ready((C_bf, A_bf, B_bf))
    assert C_bf.shape == (1, output_class)
    assert A_bf.shape == (N, output_class)
    assert B_bf.shape == (1, output_class, input_size)
    assert jnp.allclose(C_bf, C_ref, atol=2e-2, rtol=2e-2)
    assert jnp.allclose(A_bf, A_ref, atol=2e-2, rtol=2e-2)
    assert jnp.allclose(B_bf, B_ref, atol=2e-2, rtol=2e-2)

    # Exactness path: full f32 intermediates through the same kernel.
    C32, A32, B32 = bclassifier_forward(feats, c, params,
                                        compute_dtype=jnp.float32)
    jax.block_until_ready((C32, A32, B32))
    assert jnp.allclose(C32, C_ref, atol=1e-4, rtol=1e-4)
    assert jnp.allclose(A32, A_ref, atol=1e-4, rtol=1e-4)
    assert jnp.allclose(B32, B_ref, atol=1e-4, rtol=1e-4)

    # Ragged-N path: N not a multiple of the tile -> zero-pad + -inf mask,
    # and a forced small tile so the multi-tile grid + masking are exercised.
    Nr = 200
    feats_r, c_r = feats[:Nr], c[:Nr]
    C_ref_r, A_ref_r, B_ref_r = reference_forward(feats_r, c_r, params)
    C_r, A_r, B_r = bclassifier_forward(feats_r, c_r, params,
                                        compute_dtype=jnp.bfloat16, tile_n=128)
    jax.block_until_ready((C_r, A_r, B_r))
    assert A_r.shape == (Nr, output_class)
    assert jnp.allclose(C_r, C_ref_r, atol=2e-2, rtol=2e-2)
    assert jnp.allclose(A_r, A_ref_r, atol=2e-2, rtol=2e-2)
    assert jnp.allclose(B_r, B_ref_r, atol=2e-2, rtol=2e-2)

    print("KERNEL_OK")
</pallas_src>

<mosaic_0001>
module attributes {stable_mosaic.version = 11 : i64} {
  func.func @_attend_pool_kernel(%arg0: i32, %arg1: memref<256x64xbf16, #tpu.memory_space<vmem>>, %arg2: memref<8x64xbf16, #tpu.memory_space<vmem>>, %arg3: memref<64x32xbf16, #tpu.memory_space<vmem>>, %arg4: memref<1x32xf32, #tpu.memory_space<vmem>>, %arg5: memref<32x32xbf16, #tpu.memory_space<vmem>>, %arg6: memref<1x32xf32, #tpu.memory_space<vmem>>, %arg7: memref<8x256xbf16, #tpu.memory_space<vmem>>, %arg8: memref<8x1xf32, #tpu.memory_space<vmem>>, %arg9: memref<8x64xf32, #tpu.memory_space<vmem>>, %arg10: memref<8x32xf32, #tpu.memory_space<vmem>>, %arg11: memref<8x1xf32, #tpu.memory_space<vmem>>, %arg12: memref<8x1xf32, #tpu.memory_space<vmem>>, %arg13: memref<8x64xf32, #tpu.memory_space<vmem>>) attributes {dimension_semantics = [#tpu.dimension_semantics<arbitrary>], iteration_bounds = array<i64: 1>, scalar_prefetch = 0 : i64, scratch_operands = 4 : i64, tpu.core_type = #tpu.core_type<tc>, window_params = [{transform_indices = @transform_0, window_bounds = array<i64: 256, 64>}, {pipeline_mode = #tpu.pipeline_mode<synchronous>, transform_indices = @transform_1, window_bounds = array<i64: 8, 64>}, {pipeline_mode = #tpu.pipeline_mode<synchronous>, transform_indices = @transform_2, window_bounds = array<i64: 64, 32>}, {pipeline_mode = #tpu.pipeline_mode<synchronous>, transform_indices = @transform_3, window_bounds = array<i64: 1, 32>}, {pipeline_mode = #tpu.pipeline_mode<synchronous>, transform_indices = @transform_4, window_bounds = array<i64: 32, 32>}, {pipeline_mode = #tpu.pipeline_mode<synchronous>, transform_indices = @transform_5, window_bounds = array<i64: 1, 32>}, {transform_indices = @transform_6, window_bounds = array<i64: 8, 256>}, {pipeline_mode = #tpu.pipeline_mode<synchronous>, transform_indices = @transform_7, window_bounds = array<i64: 8, 1>}, {pipeline_mode = #tpu.pipeline_mode<synchronous>, transform_indices = @transform_8, window_bounds = array<i64: 8, 64>}]} {
    %c0_i32 = arith.constant 0 : i32
    %0 = arith.cmpi eq, %arg0, %c0_i32 : i32
    %1 = arith.extui %0 : i1 to i32
    %c0_i32_0 = arith.constant 0 : i32
    %2 = arith.cmpi ne, %1, %c0_i32_0 : i32
    scf.if %2 {
      %c0_34 = arith.constant 0 : index
      %c0_35 = arith.constant 0 : index
      %50 = vector.load %arg2[%c0_34, %c0_35] : memref<8x64xbf16, #tpu.memory_space<vmem>>, vector<8x64xbf16>
      %c0_36 = arith.constant 0 : index
      %c0_37 = arith.constant 0 : index
      %51 = vector.load %arg3[%c0_36, %c0_37] : memref<64x32xbf16, #tpu.memory_space<vmem>>, vector<64x32xbf16>
      %cst_38 = arith.constant dense<0.000000e+00> : vector<8x32xf32>
      %52 = tpu.matmul %50, %51, %cst_38 {dimension_numbers = #tpu.dot_dimension_numbers<[1], [0], [0], [1], [0, 0, 1, 1], [], []>} : vector<8x64xbf16>, vector<64x32xbf16>, vector<8x32xf32> -> vector<8x32xf32>
      %c0_39 = arith.constant 0 : index
      %c0_40 = arith.constant 0 : index
      %53 = vector.load %arg4[%c0_39, %c0_40] : memref<1x32xf32, #tpu.memory_space<vmem>>, vector<1x32xf32>
      %54 = vector.broadcast %53 : vector<1x32xf32> to vector<8x32xf32>
      %55 = arith.addf %52, %54 : vector<8x32xf32>
      %cst_41 = arith.constant 0.000000e+00 : f32
      %56 = vector.broadcast %cst_41 : f32 to vector<8x32xf32>
      %57 = arith.maximumf %55, %56 : vector<8x32xf32>
      %58 = arith.truncf %57 : vector<8x32xf32> to vector<8x32xbf16>
      %c0_42 = arith.constant 0 : index
      %c0_43 = arith.constant 0 : index
      %59 = vector.load %arg5[%c0_42, %c0_43] : memref<32x32xbf16, #tpu.memory_space<vmem>>, vector<32x32xbf16>
      %cst_44 = arith.constant dense<0.000000e+00> : vector<8x32xf32>
      %60 = tpu.matmul %58, %59, %cst_44 {dimension_numbers = #tpu.dot_dimension_numbers<[1], [0], [0], [1], [0, 0, 1, 1], [], []>} : vector<8x32xbf16>, vector<32x32xbf16>, vector<8x32xf32> -> vector<8x32xf32>
      %c0_45 = arith.constant 0 : index
      %c0_46 = arith.constant 0 : index
      %61 = vector.load %arg6[%c0_45, %c0_46] : memref<1x32xf32, #tpu.memory_space<vmem>>, vector<1x32xf32>
      %62 = vector.broadcast %61 : vector<1x32xf32> to vector<8x32xf32>
      %63 = arith.addf %60, %62 : vector<8x32xf32>
      %64 = math.tanh %63 : vector<8x32xf32>
      %cst_47 = arith.constant 0.176776692 : f32
      %65 = vector.broadcast %cst_47 : f32 to vector<8x32xf32>
      %66 = arith.mulf %64, %65 : vector<8x32xf32>
      %c0_48 = arith.constant 0 : index
      %c0_49 = arith.constant 0 : index
      %67 = vector.load %arg10[%c0_48, %c0_49] : memref<8x32xf32, #tpu.memory_space<vmem>>, vector<8x32xf32>
      tpu.vector_store %arg10[%c0_48, %c0_49], %66 {strides = array<i32>} : memref<8x32xf32, #tpu.memory_space<vmem>>, vector<8x32xf32>,
      %cst_50 = arith.constant 0xFF800000 : f32
      %68 = vector.broadcast %cst_50 : f32 to vector<8x1xf32>
      %c0_51 = arith.constant 0 : index
      %c0_52 = arith.constant 0 : index
      %69 = vector.load %arg11[%c0_51, %c0_52] : memref<8x1xf32, #tpu.memory_space<vmem>>, vector<8x1xf32>
      tpu.vector_store %arg11[%c0_51, %c0_52], %68 {strides = array<i32>} : memref<8x1xf32, #tpu.memory_space<vmem>>, vector<8x1xf32>,
      %cst_53 = arith.constant 0.000000e+00 : f32
      %70 = vector.broadcast %cst_53 : f32 to vector<8x1xf32>
      %c0_54 = arith.constant 0 : index
      %c0_55 = arith.constant 0 : index
      %71 = vector.load %arg12[%c0_54, %c0_55] : memref<8x1xf32, #tpu.memory_space<vmem>>, vector<8x1xf32>
      tpu.vector_store %arg12[%c0_54, %c0_55], %70 {strides = array<i32>} : memref<8x1xf32, #tpu.memory_space<vmem>>, vector<8x1xf32>,
      %cst_56 = arith.constant 0.000000e+00 : f32
      %72 = vector.broadcast %cst_56 : f32 to vector<8x64xf32>
      %c0_57 = arith.constant 0 : index
      %c0_58 = arith.constant 0 : index
      %73 = vector.load %arg13[%c0_57, %c0_58] : memref<8x64xf32, #tpu.memory_space<vmem>>, vector<8x64xf32>
      tpu.vector_store %arg13[%c0_57, %c0_58], %72 {strides = array<i32>} : memref<8x64xf32, #tpu.memory_space<vmem>>, vector<8x64xf32>,
    } else {
    }
    %c0 = arith.constant 0 : index
    %c0_1 = arith.constant 0 : index
    %3 = vector.load %arg1[%c0, %c0_1] : memref<256x64xbf16, #tpu.memory_space<vmem>>, vector<256x64xbf16>
    %c0_2 = arith.constant 0 : index
    %c0_3 = arith.constant 0 : index
    %4 = vector.load %arg3[%c0_2, %c0_3] : memref<64x32xbf16, #tpu.memory_space<vmem>>, vector<64x32xbf16>
    %cst = arith.constant dense<0.000000e+00> : vector<256x32xf32>
    %5 = tpu.matmul %3, %4, %cst {dimension_numbers = #tpu.dot_dimension_numbers<[1], [0], [0], [1], [0, 0, 1, 1], [], []>} : vector<256x64xbf16>, vector<64x32xbf16>, vector<256x32xf32> -> vector<256x32xf32>
    %c0_4 = arith.constant 0 : index
    %c0_5 = arith.constant 0 : index
    %6 = vector.load %arg4[%c0_4, %c0_5] : memref<1x32xf32, #tpu.memory_space<vmem>>, vector<1x32xf32>
    %7 = vector.broadcast %6 : vector<1x32xf32> to vector<256x32xf32>
    %8 = arith.addf %5, %7 : vector<256x32xf32>
    %cst_6 = arith.constant 0.000000e+00 : f32
    %9 = vector.broadcast %cst_6 : f32 to vector<256x32xf32>
    %10 = arith.maximumf %8, %9 : vector<256x32xf32>
    %11 = arith.truncf %10 : vector<256x32xf32> to vector<256x32xbf16>
    %c0_7 = arith.constant 0 : index
    %c0_8 = arith.constant 0 : index
    %12 = vector.load %arg5[%c0_7, %c0_8] : memref<32x32xbf16, #tpu.memory_space<vmem>>, vector<32x32xbf16>
    %cst_9 = arith.constant dense<0.000000e+00> : vector<256x32xf32>
    %13 = tpu.matmul %11, %12, %cst_9 {dimension_numbers = #tpu.dot_dimension_numbers<[1], [0], [0], [1], [0, 0, 1, 1], [], []>} : vector<256x32xbf16>, vector<32x32xbf16>, vector<256x32xf32> -> vector<256x32xf32>
    %c0_10 = arith.constant 0 : index
    %c0_11 = arith.constant 0 : index
    %14 = vector.load %arg6[%c0_10, %c0_11] : memref<1x32xf32, #tpu.memory_space<vmem>>, vector<1x32xf32>
    %15 = vector.broadcast %14 : vector<1x32xf32> to vector<256x32xf32>
    %16 = arith.addf %13, %15 : vector<256x32xf32>
    %17 = math.tanh %16 : vector<256x32xf32>
    %18 = arith.truncf %17 : vector<256x32xf32> to vector<256x32xbf16>
    %c0_12 = arith.constant 0 : index
    %c0_13 = arith.constant 0 : index
    %19 = vector.load %arg10[%c0_12, %c0_13] : memref<8x32xf32, #tpu.memory_space<vmem>>, vector<8x32xf32>
    %20 = arith.truncf %19 : vector<8x32xf32> to vector<8x32xbf16>
    %cst_14 = arith.constant dense<0.000000e+00> : vector<8x256xf32>
    %21 = tpu.matmul %20, %18, %cst_14 {dimension_numbers = #tpu.dot_dimension_numbers<[1], [1], [0], [0], [0, 0, 1, 0], [], []>} : vector<8x32xbf16>, vector<256x32xbf16>, vector<8x256xf32> -> vector<8x256xf32>
    %22 = arith.truncf %21 : vector<8x256xf32> to vector<8x256xbf16>
    %c0_15 = arith.constant 0 : index
    %c0_16 = arith.constant 0 : index
    %23 = vector.load %arg7[%c0_15, %c0_16] : memref<8x256xbf16, #tpu.memory_space<vmem>>, vector<8x256xbf16>
    tpu.vector_store %arg7[%c0_15, %c0_16], %22 {strides = array<i32>} : memref<8x256xbf16, #tpu.memory_space<vmem>>, vector<8x256xbf16>,
    %c0_17 = arith.constant 0 : index
    %c0_18 = arith.constant 0 : index
    %24 = vector.load %arg11[%c0_17, %c0_18] : memref<8x1xf32, #tpu.memory_space<vmem>>, vector<8x1xf32>
    %cst_19 = arith.constant dense<0xFF800000> : vector<8xf32>
    %25 = vector.multi_reduction <maximumf>, %21, %cst_19 [1] : vector<8x256xf32> to vector<8xf32>
    %26 = vector.shape_cast %25 : vector<8xf32> to vector<8x1xf32>
    %27 = arith.maximumf %24, %26 : vector<8x1xf32>
    %28 = arith.subf %24, %27 : vector<8x1xf32>
    %29 = math.exp %28 : vector<8x1xf32>
    %30 = vector.broadcast %27 : vector<8x1xf32> to vector<8x256xf32>
    %31 = arith.subf %21, %30 : vector<8x256xf32>
    %32 = math.exp %31 : vector<8x256xf32>
    %c0_20 = arith.constant 0 : index
    %c0_21 = arith.constant 0 : index
    %33 = vector.load %arg12[%c0_20, %c0_21] : memref<8x1xf32, #tpu.memory_space<vmem>>, vector<8x1xf32>
    %34 = arith.mulf %29, %33 : vector<8x1xf32>
    %cst_22 = arith.constant dense<0.000000e+00> : vector<8xf32>
    %35 = vector.multi_reduction <add>, %32, %cst_22 [1] : vector<8x256xf32> to vector<8xf32>
    %36 = vector.shape_cast %35 : vector<8xf32> to vector<8x1xf32>
    %37 = arith.addf %34, %36 : vector<8x1xf32>
    %c0_23 = arith.constant 0 : index
    %c0_24 = arith.constant 0 : index
    %38 = vector.load %arg12[%c0_23, %c0_24] : memref<8x1xf32, #tpu.memory_space<vmem>>, vector<8x1xf32>
    tpu.vector_store %arg12[%c0_23, %c0_24], %37 {strides = array<i32>} : memref<8x1xf32, #tpu.memory_space<vmem>>, vector<8x1xf32>,
    %c0_25 = arith.constant 0 : index
    %c0_26 = arith.constant 0 : index
    %39 = vector.load %arg13[%c0_25, %c0_26] : memref<8x64xf32, #tpu.memory_space<vmem>>, vector<8x64xf32>
    %40 = vector.broadcast %29 : vector<8x1xf32> to vector<8x64xf32>
    %41 = arith.mulf %40, %39 : vector<8x64xf32>
    %42 = arith.truncf %32 : vector<8x256xf32> to vector<8x256xbf16>
    %cst_27 = arith.constant dense<0.000000e+00> : vector<8x64xf32>
    %43 = tpu.matmul %42, %3, %cst_27 {dimension_numbers = #tpu.dot_dimension_numbers<[1], [0], [0], [1], [0, 0, 1, 1], [], []>} : vector<8x256xbf16>, vector<256x64xbf16>, vector<8x64xf32> -> vector<8x64xf32>
    %44 = arith.addf %41, %43 : vector<8x64xf32>
    %c0_28 = arith.constant 0 : index
    %c0_29 = arith.constant 0 : index
    %45 = vector.load %arg13[%c0_28, %c0_29] : memref<8x64xf32, #tpu.memory_space<vmem>>, vector<8x64xf32>
    tpu.vector_store %arg13[%c0_28, %c0_29], %44 {strides = array<i32>} : memref<8x64xf32, #tpu.memory_space<vmem>>, vector<8x64xf32>,
    %c0_30 = arith.constant 0 : index
    %c0_31 = arith.constant 0 : index
    %46 = vector.load %arg11[%c0_30, %c0_31] : memref<8x1xf32, #tpu.memory_space<vmem>>, vector<8x1xf32>
    tpu.vector_store %arg11[%c0_30, %c0_31], %27 {strides = array<i32>} : memref<8x1xf32, #tpu.memory_space<vmem>>, vector<8x1xf32>,
    %c0_i32_32 = arith.constant 0 : i32
    %47 = arith.cmpi eq, %arg0, %c0_i32_32 : i32
    %48 = arith.extui %47 : i1 to i32
    %c0_i32_33 = arith.constant 0 : i32
    %49 = arith.cmpi ne, %48, %c0_i32_33 : i32
    scf.if %49 {
      %c0_34 = arith.constant 0 : index
      %c0_35 = arith.constant 0 : index
      %50 = vector.load %arg12[%c0_34, %c0_35] : memref<8x1xf32, #tpu.memory_space<vmem>>, vector<8x1xf32>
      %c0_36 = arith.constant 0 : index
      %c0_37 = arith.constant 0 : index
      %51 = vector.load %arg13[%c0_36, %c0_37] : memref<8x64xf32, #tpu.memory_space<vmem>>, vector<8x64xf32>
      %52 = vector.broadcast %50 : vector<8x1xf32> to vector<8x64xf32>
      %53 = arith.divf %51, %52 : vector<8x64xf32>
      %c0_38 = arith.constant 0 : index
      %c0_39 = arith.constant 0 : index
      %54 = vector.load %arg9[%c0_38, %c0_39] : memref<8x64xf32, #tpu.memory_space<vmem>>, vector<8x64xf32>
      tpu.vector_store %arg9[%c0_38, %c0_39], %53 {strides = array<i32>} : memref<8x64xf32, #tpu.memory_space<vmem>>, vector<8x64xf32>,
      %c0_40 = arith.constant 0 : index
      %c0_41 = arith.constant 0 : index
      %55 = vector.load %arg11[%c0_40, %c0_41] : memref<8x1xf32, #tpu.memory_space<vmem>>, vector<8x1xf32>
      %56 = math.log %50 : vector<8x1xf32>
      %57 = arith.addf %55, %56 : vector<8x1xf32>
      %c0_42 = arith.constant 0 : index
      %c0_43 = arith.constant 0 : index
      %58 = vector.load %arg8[%c0_42, %c0_43] : memref<8x1xf32, #tpu.memory_space<vmem>>, vector<8x1xf32>
      tpu.vector_store %arg8[%c0_42, %c0_43], %57 {strides = array<i32>} : memref<8x1xf32, #tpu.memory_space<vmem>>, vector<8x1xf32>,
    } else {
    }
    return
  }
  func.func @transform_0(%arg0: i32) -> (i32, i32) {
    %c0_i32 = arith.constant 0 : i32
    %c0_i32_0 = arith.constant 0 : i32
    return %arg0, %c0_i32 : i32, i32
  }
  func.func @transform_1(%arg0: i32) -> (i32, i32) {
    %c0_i32 = arith.constant 0 : i32
    %c0_i32_0 = arith.constant 0 : i32
    %c0_i32_1 = arith.constant 0 : i32
    return %c0_i32, %c0_i32_0 : i32, i32
  }
  func.func @transform_2(%arg0: i32) -> (i32, i32) {
    %c0_i32 = arith.constant 0 : i32
    %c0_i32_0 = arith.constant 0 : i32
    %c0_i32_1 = arith.constant 0 : i32
    return %c0_i32, %c0_i32_0 : i32, i32
  }
  func.func @transform_3(%arg0: i32) -> (i32, i32) {
    %c0_i32 = arith.constant 0 : i32
    %c0_i32_0 = arith.constant 0 : i32
    %c0_i32_1 = arith.constant 0 : i32
    return %c0_i32, %c0_i32_0 : i32, i32
  }
  func.func @transform_4(%arg0: i32) -> (i32, i32) {
    %c0_i32 = arith.constant 0 : i32
    %c0_i32_0 = arith.constant 0 : i32
    %c0_i32_1 = arith.constant 0 : i32
    return %c0_i32, %c0_i32_0 : i32, i32
  }
  func.func @transform_5(%arg0: i32) -> (i32, i32) {
    %c0_i32 = arith.constant 0 : i32
    %c0_i32_0 = arith.constant 0 : i32
    %c0_i32_1 = arith.constant 0 : i32
    return %c0_i32, %c0_i32_0 : i32, i32
  }
  func.func @transform_6(%arg0: i32) -> (i32, i32) {
    %c0_i32 = arith.constant 0 : i32
    %c0_i32_0 = arith.constant 0 : i32
    return %c0_i32, %arg0 : i32, i32
  }
  func.func @transform_7(%arg0: i32) -> (i32, i32) {
    %c0_i32 = arith.constant 0 : i32
    %c0_i32_0 = arith.constant 0 : i32
    %c0_i32_1 = arith.constant 0 : i32
    return %c0_i32, %c0_i32_0 : i32, i32
  }
  func.func @transform_8(%arg0: i32) -> (i32, i32) {
    %c0_i32 = arith.constant 0 : i32
    %c0_i32_0 = arith.constant 0 : i32
    %c0_i32_1 = arith.constant 0 : i32
    return %c0_i32, %c0_i32_0 : i32, i32
  }
}

</mosaic_0001>

<bundles_post_ra>
// kernel: tpu_custom_call.1
= control target key start
LH: loop header
LB: loop body
LE: loop exit
PB: predicated region body
PF: predicated region fallthrough
CT: control target
= control target key end

     0   :  { %14 = vsyncpa [#allocation7], 0  ;;  %v1550_v1 = vmov 0.0   ;;  %vm1551_vm0 = vmmov 0   ;;  %vm73_vm1 = vcmask 523264   ;;  %s1938_s0 = inlined_call_operand.vmem [shape: bf16[256,64], index: 0, kind: input, shape index: {}]   ;;  %s1939_s1 = inlined_call_operand.vmem [shape: bf16[8,64], index: 1, kind: input, shape index: {}]   ;;  %s1940_s2 = inlined_call_operand.vmem [shape: bf16[64,32], index: 2, kind: input, shape index: {}]   ;;  %s1941_s3 = inlined_call_operand.vmem [shape: f32[1,32], index: 3, kind: input, shape index: {}]   ;;  %s1942_s4 = inlined_call_operand.vmem [shape: bf16[32,32], index: 4, kind: input, shape index: {}]   ;;  %s1943_s5 = inlined_call_operand.vmem [shape: f32[1,32], index: 5, kind: input, shape index: {}]   ;;  %s1944_s6 = inlined_call_operand.hbm [shape: bf16[8,256], index: 6, kind: output, shape index: {0}]   ;;  %s1945_s7 = inlined_call_operand.vmem [shape: f32[8,1], index: 7, kind: output, shape index: {1}]   ;;  %s1946_s8 = inlined_call_operand.hbm [shape: f32[8,64], index: 8, kind: output, shape index: {2}]  }
   0x1   :  { %v1398_v0 = vld [vmem:[%s1940_s2] sm:$0xff]   ;;  %1286 = vmatprep.subr.bf16.mxu0 %v1550_v1  ;;  %1298 = vmatprep.subr.bf16.mxu1 %v1550_v1  ;;  %v1399_v2 = vld [vmem:[%s1940_s2 + $0x8] sm:$0xff]   ;;  %192 = vst.msk [vmem:[#allocation5] sm:$0xff] %vm73_vm1, %v1550_v1  ;;  %v1400_v3 = vld [vmem:[%s1940_s2 + $0x10] sm:$0xff]  }
   0x2   :  { %1287 = vmatpush3.bf16.msra.mxu0 %v1398_v0  ;;  %1294 = vmatprep.mubr.msk.bf16.mxu0 %vm1551_vm0, %v1550_v1  ;;  %v1402_v4 = vld [vmem:[%s1942_s4] sm:$0xff]   ;;  %v1401_v5 = vld [vmem:[%s1940_s2 + $0x18] sm:$0xff]  }
   0x3   :  { %1288 = vmatprep.subr.bf16.mxu0 %v1550_v1  ;;  %1302 = vmatprep.mubr.msk.bf16.mxu1 %vm1551_vm0, %v1550_v1  ;;  %v33_v6 = vld [vmem:[%s1939_s1] sm:$0xf] }
   0x4   :  { %1299 = vmatpush3.bf16.msra.mxu1 %v1402_v4 }
   0x5   :  { %1300 = vmatprep.subr.bf16.mxu1 %v1550_v1 }
   0x6   :  { %1289 = vmatpush3.bf16.msra.mxu0 %v1399_v2 }
   0x7   :  { %1290 = vmatprep.subr.bf16.mxu0 %v1550_v1 }
   0xa   :  { %1291 = vmatpush3.bf16.msra.mxu0 %v1400_v3 }
   0xb   :  { %1292 = vmatprep.subr.bf16.mxu0 %v1550_v1 }
   0xe   :  { %1293 = vmatpush3.bf16.msra.mxu0 %v1401_v5 }
  0x11   :  { %1295 = vmatmul.mubr.msk.bf16.vlgmr.msra.gmra.mrb[0].mxu0 %vm73_vm1, %v33_v6 }
  0x12   :  { %15 = vsyncpa [#allocation9], 0  ;;  %v1403_v7 = vld [vmem:[%s1942_s4 + $0x8] sm:$0xff]   ;;  %v1404_v8 = vld [vmem:[%s1940_s2] sm:$0xff]   ;;  %vm142_vm2 = vcmask 261120   ;;  %vm189_vm3 = vcmask 7168  }
  0x13   :  { %1301 = vmatpush3.bf16.msra.mxu1 %v1403_v7  ;;  %v1639_v9 = vld [vmem:[%s1941_s3] ss:$0 sm:$0xff]  ;;  %v1405_v18 = vld [vmem:[%s1940_s2 + $0x8] sm:$0xff]   ;;  %v1406_v19 = vld [vmem:[%s1940_s2 + $0x10] sm:$0xff]   ;;  %191 = vst.msk [vmem:[#allocation4] sm:$0xff] %vm189_vm3, %v1550_v1 }
  0x14   :  { %1306 = vmatprep.subr.bf16.mxu1 %v1404_v8  ;;  %v1408_v16 = vld [vmem:[%s1938_s0] sm:$0xff]   ;;  %v1407_v20 = vld [vmem:[%s1940_s2 + $0x18] sm:$0xff]   ;;  %v1409_v21 = vld [vmem:[%s1938_s0 + $0x8] sm:$0xff]  }
  0x15   :  { %v1416_v22 = vld [vmem:[%s1938_s0 + $0x40] sm:$0xff]   ;;  %v1410_v23 = vld [vmem:[%s1938_s0 + $0x10] sm:$0xff]   ;;  %v1417_v24 = vld [vmem:[%s1938_s0 + $0x48] sm:$0xff]  }
  0x16   :  { %v1411_v25 = vld [vmem:[%s1938_s0 + $0x18] sm:$0xff]   ;;  %v1418_v26 = vld [vmem:[%s1938_s0 + $0x50] sm:$0xff]   ;;  %v1412_v27 = vld [vmem:[%s1938_s0 + $0x20] sm:$0xff]  }
  0x17   :  { %v1419_v28 = vld [vmem:[%s1938_s0 + $0x58] sm:$0xff]   ;;  %v1413_v29 = vld [vmem:[%s1938_s0 + $0x28] sm:$0xff]   ;;  %v1420_v30 = vld [vmem:[%s1938_s0 + $0x60] sm:$0xff]  }
  0x18   :  { %v1414_v31 = vld [vmem:[%s1938_s0 + $0x30] sm:$0xff]   ;;  %v1421_v32 = vld [vmem:[%s1938_s0 + $0x68] sm:$0xff]   ;;  %v1415_v33 = vld [vmem:[%s1938_s0 + $0x38] sm:$0xff]  }
  0x19   :  { %v1422_v34 = vld [vmem:[%s1938_s0 + $0x70] sm:$0xff]   ;;  %v1423_v35 = vld [vmem:[%s1938_s0 + $0x78] sm:$0xff]   ;;  %v1424_v36 = vld [vmem:[%s1942_s4] sm:$0xff]  }
  0x1a   :  { %1346 = vmatprep.subr.bf16.mxu0 %v1424_v36  ;;  %v1425_v37 = vld [vmem:[%s1942_s4 + $0x8] sm:$0xff]   ;;  %v1725_v38 = vld [vmem:[%s1943_s5] ss:$0 sm:$0xff]  ;;  %s1554_s4 = smov [#allocation6]  }
  0x1b   :  { %1347 = vmatpush3.bf16.msra.mxu0 %v1424_v36  ;;  %s1105_s5 = sshll.u32 %s1554_s4, 4  ;;  %s1106_s5 = int_to_ptr.vmem [resolvable:$true] %s1105_s5 }
  0x1c   :  { %1348 = vmatprep.subr.bf16.mxu0 %v1425_v37  ;;  %s1502_s16 = scalar_lea.vmem %s1106_s5, 128  ;;  %p1507_p1 = scmp.lt.s32.totalorder %s1106_s5, %s1106_s5 }
  0x1d   :  { %p1503_p0 = scmp.ne.s32.totalorder %s1106_s5, %s1502_s16  ;;  %p1508_p2 = scmp.lt.s32.totalorder %s1502_s16, %s1502_s16 }
  0x1f   :  { %1349 = vmatpush3.bf16.msra.mxu0 %v1425_v37  ;;  %p1509_p3 = por %p1508_p2, %p1507_p1 }
  0x21   :  { %p1510_p4 = pnand %p1509_p3, %p1503_p0 }
  0xe4   :  { %v111_v10 = vpop.f32.mrb[0].mxu0 }
  0xe5   :  { %v112_v11 = vadd.f32 %v1639_v9, %v111_v10  ;;  %v1296_v12 = vpop.f32.mrb[1].mxu0 }
  0xe6   :  { %v114_v13 = vpop.f32.mrb[2].mxu0 }
  0xe7   :  { %v117_v14 = vmax.f32 %v112_v11, 0.0  ;;  %v1297_v15 = vpop.f32.mrb[3].mxu0 }
  0xe9   :  { %v118_v17 = vpack.c.bf16 %v117_v14, %v117_v14 }
  0xeb   :  { %1303 = vmatmul.mubr.msk.bf16.vlgmr.msra.gmra.mrb[0].mxu1 %vm142_vm2, %v118_v17 }
  0xec   :  { %1307 = vmatpush3.bf16.msra.mxu1 %v1404_v8  ;;  %1314 = vmatprep.mubr.msk.bf16.mxu1 %vm73_vm1, %v1408_v16 }
  0xed   :  { %1308 = vmatprep.subr.bf16.mxu1 %v1405_v18 }
  0xf0   :  { %1309 = vmatpush3.bf16.msra.mxu1 %v1405_v18 }
  0xf1   :  { %1310 = vmatprep.subr.bf16.mxu1 %v1406_v19 }
  0xf4   :  { %1311 = vmatpush3.bf16.msra.mxu1 %v1406_v19 }
  0xf5   :  { %1312 = vmatprep.subr.bf16.mxu1 %v1407_v20 }
  0xf8   :  { %1313 = vmatpush3.bf16.msra.mxu1 %v1407_v20 }
  0xf9   :  { %1264 = vmatprep.subr.bf16.mxu1 %v1416_v22 }
  0xfb   :  { %1315 = vmatmul.mubr.msk.bf16.vlgmr.msra.gmra.mrb[4].mxu1 %vm73_vm1, %v1409_v21 }
  0xfc   :  { %1318 = vmatprep.mubr.msk.bf16.mxu1 %vm73_vm1, %v1410_v23  ;;  %1265 = vmatpush3.bf16.msra.mxu1 %v1408_v16 }
  0xfd   :  { %1266 = vmatprep.subr.bf16.mxu1 %v1417_v24 }
 0x100   :  { %1267 = vmatpush3.bf16.msra.mxu1 %v1409_v21 }
 0x101   :  { %1268 = vmatprep.subr.bf16.mxu1 %v1418_v26 }
 0x103   :  { %1319 = vmatmul.mubr.msk.bf16.gmra.mrb[8].mxu1 %vm73_vm1, %v1411_v25 }
 0x104   :  { %1322 = vmatprep.mubr.msk.bf16.mxu1 %vm73_vm1, %v1412_v27  ;;  %1269 = vmatpush3.bf16.msra.mxu1 %v1410_v23 }
 0x105   :  { %1270 = vmatprep.subr.bf16.mxu1 %v1419_v28 }
 0x108   :  { %1271 = vmatpush3.bf16.msra.mxu1 %v1411_v25 }
 0x109   :  { %1272 = vmatprep.subr.bf16.mxu1 %v1420_v30 }
 0x10b   :  { %1323 = vmatmul.mubr.msk.bf16.gmra.mrb[12].mxu1 %vm73_vm1, %v1413_v29 }
 0x10c   :  { %1326 = vmatprep.mubr.msk.bf16.mxu1 %vm73_vm1, %v1414_v31  ;;  %1273 = vmatpush3.bf16.msra.mxu1 %v1412_v27 }
 0x10d   :  { %1274 = vmatprep.subr.bf16.mxu1 %v1421_v32 }
 0x110   :  { %1275 = vmatpush3.bf16.msra.mxu1 %v1413_v29 }
 0x111   :  { %1276 = vmatprep.subr.bf16.mxu1 %v1422_v34 }
 0x113   :  { %1327 = vmatmul.mubr.msk.bf16.gmra.mrb[16].mxu1 %vm73_vm1, %v1415_v33 }
 0x114   :  { %1330 = vmatprep.mubr.msk.bf16.mxu1 %vm73_vm1, %v1416_v22  ;;  %1277 = vmatpush3.bf16.msra.mxu1 %v1414_v31 }
 0x115   :  { %1278 = vmatprep.subr.bf16.mxu1 %v1423_v35 }
 0x118   :  { %1279 = vmatpush3.bf16.msra.mxu1 %v1415_v33 }
 0x11b   :  { %1331 = vmatmul.mubr.msk.bf16.gmra.mrb[20].mxu1 %vm73_vm1, %v1417_v24 }
 0x11c   :  { %1334 = vmatprep.mubr.msk.bf16.mxu1 %vm73_vm1, %v1418_v26 }
 0x123   :  { %1335 = vmatmul.mubr.msk.bf16.gmra.mrb[24].mxu1 %vm73_vm1, %v1419_v28 }
 0x124   :  { %1338 = vmatprep.mubr.msk.bf16.mxu1 %vm73_vm1, %v1420_v30 }
 0x12b   :  { %1339 = vmatmul.mubr.msk.bf16.gmra.mrb[28].mxu1 %vm73_vm1, %v1421_v32 }
 0x12c   :  { %1342 = vmatprep.mubr.msk.bf16.mxu1 %vm73_vm1, %v1422_v34 }
 0x133   :  { %1343 = vmatmul.mubr.msk.bf16.gmra.mrb[32].mxu1 %vm73_vm1, %v1423_v35 }
 0x1be   :  { %v180_v39 = vpop.f32.mrb[0].mxu1 }
 0x1bf   :  { %v181_v40 = vadd.f32 %v1725_v38, %v180_v39  ;;  %v1304_v41 = vpop.f32.mrb[1].mxu1 }
 0x1c0   :  { %v183_v42 = vpop.f32.mrb[2].mxu1 }
 0x1c1   :  { %1426 = vtanh.f32 %v181_v40  ;;  %v1305_v43 = vpop.f32.mrb[3].mxu1 }
 0x1cb   :  { %v1427_v44 = vpop.eup %1426 }
 0x1cc   :  { %v187_v45 = vmul.f32 0.17677669, %v1427_v44 }
 0x1ce   :  { %188 = vst.msk [vmem:[#allocation2] sm:$0xff] %vm142_vm2, %v187_v45  ;;  %v1316_v46 = vpop.f32.mrb[4].mxu1 }
 0x1cf   :  { %v436_v47 = vadd.f32 %v1316_v46, %v1639_v9  ;;  %v427_v48 = vpop.f32.mrb[5].mxu1 }
 0x1d0   :  { %v428_v49 = vadd.f32 %v1639_v9, %v427_v48  ;;  %v1317_v50 = vpop.f32.mrb[6].mxu1 }
 0x1d1   :  { %v439_v51 = vadd.f32 %v1317_v50, %v1639_v9  ;;  %v430_v52 = vpop.f32.mrb[7].mxu1  ;;  %v556_v54 = vmax.f32 %v436_v47, 0.0 }
 0x1d2   :  { %v431_v53 = vadd.f32 %v1639_v9, %v430_v52  ;;  %v554_v56 = vmax.f32 %v428_v49, 0.0 }
 0x1d3   :  { %v557_v55 = vmax.f32 %v439_v51, 0.0 }
 0x1d4   :  { %v555_v57 = vmax.f32 %v431_v53, 0.0 }
 0x1d5   :  { %v587_v58 = vpack.c.bf16 %v557_v55, %v556_v54 }
 0x1d6   :  { %v586_v59 = vpack.c.bf16 %v555_v57, %v554_v56  ;;  %v1320_v60 = vpop.f32.mrb[8].mxu1 }
 0x1d7   :  { %v452_v61 = vadd.f32 %v1320_v60, %v1639_v9  ;;  %v443_v62 = vpop.f32.mrb[9].mxu1 }
 0x1d8   :  { %v444_v63 = vadd.f32 %v1639_v9, %v443_v62  ;;  %v1321_v0 = vpop.f32.mrb[10].mxu1  ;;  %1350 = vmatprep.mubr.msk.bf16.mxu0 %vm142_vm2, %v586_v59 }
 0x1d9   :  { %v455_v2 = vadd.f32 %v1321_v0, %v1639_v9  ;;  %v446_v3 = vpop.f32.mrb[11].mxu1  ;;  %1351 = vmatmul.mubr.msk.bf16.vlgmr.msra.gmra.mrb[4].mxu0 %vm142_vm2, %v587_v58  ;;  %v560_v5 = vmax.f32 %v452_v61, 0.0 }
 0x1da   :  { %v447_v4 = vadd.f32 %v1639_v9, %v446_v3  ;;  %v558_v7 = vmax.f32 %v444_v63, 0.0 }
 0x1db   :  { %v561_v6 = vmax.f32 %v455_v2, 0.0 }
 0x1dc   :  { %v559_v8 = vmax.f32 %v447_v4, 0.0 }
 0x1dd   :  { %v589_v10 = vpack.c.bf16 %v561_v6, %v560_v5 }
 0x1de   :  { %v588_v11 = vpack.c.bf16 %v559_v8, %v558_v7  ;;  %v1324_v12 = vpop.f32.mrb[12].mxu1 }
 0x1df   :  { %v468_v13 = vadd.f32 %v1324_v12, %v1639_v9  ;;  %v459_v14 = vpop.f32.mrb[13].mxu1 }
 0x1e0   :  { %v460_v15 = vadd.f32 %v1639_v9, %v459_v14  ;;  %v1325_v16 = vpop.f32.mrb[14].mxu1  ;;  %1354 = vmatprep.mubr.msk.bf16.mxu0 %vm142_vm2, %v588_v11 }
 0x1e1   :  { %v471_v17 = vadd.f32 %v1325_v16, %v1639_v9  ;;  %v462_v18 = vpop.f32.mrb[15].mxu1  ;;  %1355 = vmatmul.mubr.msk.bf16.gmra.mrb[8].mxu0 %vm142_vm2, %v589_v10  ;;  %v564_v20 = vmax.f32 %v468_v13, 0.0 }
 0x1e2   :  { %v463_v19 = vadd.f32 %v1639_v9, %v462_v18  ;;  %v562_v22 = vmax.f32 %v460_v15, 0.0 }
 0x1e3   :  { %v565_v21 = vmax.f32 %v471_v17, 0.0 }
 0x1e4   :  { %v563_v23 = vmax.f32 %v463_v19, 0.0 }
 0x1e5   :  { %v591_v24 = vpack.c.bf16 %v565_v21, %v564_v20 }
 0x1e6   :  { %v590_v25 = vpack.c.bf16 %v563_v23, %v562_v22  ;;  %v1328_v26 = vpop.f32.mrb[16].mxu1 }
 0x1e7   :  { %v484_v27 = vadd.f32 %v1328_v26, %v1639_v9  ;;  %v475_v28 = vpop.f32.mrb[17].mxu1 }
 0x1e8   :  { %v476_v29 = vadd.f32 %v1639_v9, %v475_v28  ;;  %v1329_v30 = vpop.f32.mrb[18].mxu1  ;;  %1358 = vmatprep.mubr.msk.bf16.mxu0 %vm142_vm2, %v590_v25 }
 0x1e9   :  { %v487_v31 = vadd.f32 %v1329_v30, %v1639_v9  ;;  %v478_v32 = vpop.f32.mrb[19].mxu1  ;;  %1359 = vmatmul.mubr.msk.bf16.gmra.mrb[12].mxu0 %vm142_vm2, %v591_v24  ;;  %v568_v34 = vmax.f32 %v484_v27, 0.0 }
 0x1ea   :  { %v479_v33 = vadd.f32 %v1639_v9, %v478_v32  ;;  %v566_v36 = vmax.f32 %v476_v29, 0.0 }
 0x1eb   :  { %v569_v35 = vmax.f32 %v487_v31, 0.0 }
 0x1ec   :  { %v567_v37 = vmax.f32 %v479_v33, 0.0 }
 0x1ed   :  { %v593_v39 = vpack.c.bf16 %v569_v35, %v568_v34  ;;  %v883_v34 = vld [vmem:[#allocation2] sm:$0xff] }
 0x1ee   :  { %v592_v40 = vpack.c.bf16 %v567_v37, %v566_v36  ;;  %v1332_v41 = vpop.f32.mrb[20].mxu1  ;;  %v1776_v36 = vpack.c.bf16 %v883_v34, %v883_v34 }
 0x1ef   :  { %v500_v42 = vadd.f32 %v1332_v41, %v1639_v9  ;;  %v491_v43 = vpop.f32.mrb[21].mxu1 }
 0x1f0   :  { %v492_v44 = vadd.f32 %v1639_v9, %v491_v43  ;;  %v1333_v45 = vpop.f32.mrb[22].mxu1  ;;  %1362 = vmatprep.mubr.msk.bf16.mxu0 %vm142_vm2, %v592_v40 }
 0x1f1   :  { %v503_v46 = vadd.f32 %v1333_v45, %v1639_v9  ;;  %v494_v47 = vpop.f32.mrb[23].mxu1  ;;  %1363 = vmatmul.mubr.msk.bf16.gmra.mrb[16].mxu0 %vm142_vm2, %v593_v39  ;;  %v572_v49 = vmax.f32 %v500_v42, 0.0 }
 0x1f2   :  { %v495_v48 = vadd.f32 %v1639_v9, %v494_v47  ;;  %v570_v51 = vmax.f32 %v492_v44, 0.0 }
 0x1f3   :  { %v573_v50 = vmax.f32 %v503_v46, 0.0 }
 0x1f4   :  { %v571_v52 = vmax.f32 %v495_v48, 0.0 }
 0x1f5   :  { %v595_v53 = vpack.c.bf16 %v573_v50, %v572_v49 }
 0x1f6   :  { %v594_v54 = vpack.c.bf16 %v571_v52, %v570_v51  ;;  %v1336_v55 = vpop.f32.mrb[24].mxu1 }
 0x1f7   :  { %v516_v56 = vadd.f32 %v1336_v55, %v1639_v9  ;;  %v507_v57 = vpop.f32.mrb[25].mxu1 }
 0x1f8   :  { %v508_v58 = vadd.f32 %v1639_v9, %v507_v57  ;;  %v1337_v59 = vpop.f32.mrb[26].mxu1  ;;  %1366 = vmatprep.mubr.msk.bf16.mxu0 %vm142_vm2, %v594_v54 }
 0x1f9   :  { %v576_v60 = vmax.f32 %v516_v56, 0.0  ;;  %v519_v61 = vadd.f32 %v1337_v59, %v1639_v9  ;;  %v510_v62 = vpop.f32.mrb[27].mxu1  ;;  %1367 = vmatmul.mubr.msk.bf16.gmra.mrb[20].mxu0 %vm142_vm2, %v595_v53 }
 0x1fa   :  { %v574_v63 = vmax.f32 %v508_v58, 0.0  ;;  %v511_v0 = vadd.f32 %v1639_v9, %v510_v62 }
 0x1fb   :  { %v577_v2 = vmax.f32 %v519_v61, 0.0 }
 0x1fc   :  { %v575_v3 = vmax.f32 %v511_v0, 0.0 }
 0x1fd   :  { %v597_v4 = vpack.c.bf16 %v577_v2, %v576_v60 }
 0x1fe   :  { %v596_v5 = vpack.c.bf16 %v575_v3, %v574_v63  ;;  %v1340_v6 = vpop.f32.mrb[28].mxu1 }
 0x1ff   :  { %v532_v7 = vadd.f32 %v1340_v6, %v1639_v9  ;;  %v523_v8 = vpop.f32.mrb[29].mxu1 }
 0x200   :  { %v524_v10 = vadd.f32 %v1639_v9, %v523_v8  ;;  %v1341_v11 = vpop.f32.mrb[30].mxu1  ;;  %1370 = vmatprep.mubr.msk.bf16.mxu0 %vm142_vm2, %v596_v5 }
 0x201   :  { %v580_v12 = vmax.f32 %v532_v7, 0.0  ;;  %v535_v13 = vadd.f32 %v1341_v11, %v1639_v9  ;;  %v526_v14 = vpop.f32.mrb[31].mxu1  ;;  %1371 = vmatmul.mubr.msk.bf16.gmra.mrb[24].mxu0 %vm142_vm2, %v597_v4 }
 0x202   :  { %v578_v15 = vmax.f32 %v524_v10, 0.0  ;;  %v527_v16 = vadd.f32 %v1639_v9, %v526_v14 }
 0x203   :  { %v581_v17 = vmax.f32 %v535_v13, 0.0 }
 0x204   :  { %v579_v18 = vmax.f32 %v527_v16, 0.0 }
 0x205   :  { %v599_v19 = vpack.c.bf16 %v581_v17, %v580_v12 }
 0x206   :  { %v598_v20 = vpack.c.bf16 %v579_v18, %v578_v15  ;;  %v1344_v21 = vpop.f32.mrb[32].mxu1 }
 0x207   :  { %v548_v22 = vadd.f32 %v1344_v21, %v1639_v9  ;;  %v539_v23 = vpop.f32.mrb[33].mxu1 }
 0x208   :  { %v540_v24 = vadd.f32 %v1639_v9, %v539_v23  ;;  %v1345_v25 = vpop.f32.mrb[34].mxu1  ;;  %1374 = vmatprep.mubr.msk.bf16.mxu0 %vm142_vm2, %v598_v20 }
 0x209   :  { %v584_v26 = vmax.f32 %v548_v22, 0.0  ;;  %v551_v27 = vadd.f32 %v1345_v25, %v1639_v9  ;;  %v542_v28 = vpop.f32.mrb[35].mxu1  ;;  %1375 = vmatmul.mubr.msk.bf16.gmra.mrb[28].mxu0 %vm142_vm2, %v599_v19 }
 0x20a   :  { %v582_v29 = vmax.f32 %v540_v24, 0.0  ;;  %v543_v30 = vadd.f32 %v1639_v9, %v542_v28 }
 0x20b   :  { %v585_v31 = vmax.f32 %v551_v27, 0.0 }
 0x20c   :  { %v583_v32 = vmax.f32 %v543_v30, 0.0 }
 0x20d   :  { %v601_v33 = vpack.c.bf16 %v585_v31, %v584_v26 }
 0x20e   :  { %v600_v35 = vpack.c.bf16 %v583_v32, %v582_v29 }
 0x210   :  { %1378 = vmatprep.mubr.msk.bf16.mxu0 %vm142_vm2, %v600_v35 }
 0x211   :  { %1379 = vmatmul.mubr.msk.bf16.gmra.mrb[32].mxu0 %vm142_vm2, %v601_v33 }
 0x212   :  { %1262 = vmatprep.mubr.msk.bf16.mxu0 %vm142_vm2, %v1776_v36 }
 0x2ac   :  { %v1352_v37 = vpop.f32.mrb[4].mxu0 }
 0x2ad   :  { %v717_v39 = vadd.f32 %v1352_v37, %v1725_v38  ;;  %v708_v40 = vpop.f32.mrb[5].mxu0 }
 0x2ae   :  { %v709_v9 = vadd.f32 %v1725_v38, %v708_v40  ;;  %v1353_v41 = vpop.f32.mrb[6].mxu0 }
 0x2af   :  { %1428 = vtanh.f32 %v717_v39  ;;  %v720_v42 = vadd.f32 %v1353_v41, %v1725_v38  ;;  %v711_v43 = vpop.f32.mrb[7].mxu0 }
 0x2b0   :  { %1430 = vtanh.f32 %v709_v9  ;;  %v712_v44 = vadd.f32 %v1725_v38, %v711_v43 }
 0x2b1   :  { %1432 = vtanh.f32 %v720_v42 }
 0x2b2   :  { %1434 = vtanh.f32 %v712_v44 }
 0x2b4   :  { %v1356_v45 = vpop.f32.mrb[8].mxu0 }
 0x2b5   :  { %v733_v46 = vadd.f32 %v1356_v45, %v1725_v38  ;;  %v724_v47 = vpop.f32.mrb[9].mxu0 }
 0x2b6   :  { %v725_v48 = vadd.f32 %v1725_v38, %v724_v47  ;;  %v1357_v49 = vpop.f32.mrb[10].mxu0 }
 0x2b7   :  { %1436 = vtanh.f32 %v733_v46  ;;  %v736_v50 = vadd.f32 %v1357_v49, %v1725_v38  ;;  %v727_v51 = vpop.f32.mrb[11].mxu0 }
 0x2b8   :  { %1438 = vtanh.f32 %v725_v48  ;;  %v728_v52 = vadd.f32 %v1725_v38, %v727_v51 }
 0x2b9   :  { %v1789_v53 = vpop.eup %1428  ;;  %1440 = vtanh.f32 %v736_v50 }
 0x2ba   :  { %v1791_v54 = vpop.eup %1430  ;;  %1442 = vtanh.f32 %v728_v52 }
 0x2bb   :  { %v1793_v55 = vpop.eup %1432 }
 0x2bc   :  { %v1795_v56 = vpop.eup %1434  ;;  %v1360_v57 = vpop.f32.mrb[12].mxu0  ;;  %v868_v58 = vpack.c.bf16 %v1793_v55, %v1789_v53 }
 0x2bd   :  { %v749_v59 = vadd.f32 %v1360_v57, %v1725_v38  ;;  %v740_v60 = vpop.f32.mrb[13].mxu0  ;;  %v867_v61 = vpack.c.bf16 %v1795_v56, %v1791_v54 }
 0x2be   :  { %v741_v62 = vadd.f32 %v1725_v38, %v740_v60  ;;  %v1361_v63 = vpop.f32.mrb[14].mxu0 }
 0x2bf   :  { %1444 = vtanh.f32 %v749_v59  ;;  %v752_v0 = vadd.f32 %v1361_v63, %v1725_v38  ;;  %v743_v2 = vpop.f32.mrb[15].mxu0 }
 0x2c0   :  { %1446 = vtanh.f32 %v741_v62  ;;  %v744_v3 = vadd.f32 %v1725_v38, %v743_v2  ;;  %v889_v2 = vsel %vm142_vm2, %v867_v61, 0 }
 0x2c1   :  { %v1805_v4 = vpop.eup %1436  ;;  %1448 = vtanh.f32 %v752_v0 }
 0x2c2   :  { %v1807_v5 = vpop.eup %1438  ;;  %1450 = vtanh.f32 %v744_v3 }
 0x2c3   :  { %v1809_v6 = vpop.eup %1440 }
 0x2c4   :  { %v1811_v7 = vpop.eup %1442  ;;  %v1364_v8 = vpop.f32.mrb[16].mxu0  ;;  %v870_v10 = vpack.c.bf16 %v1809_v6, %v1805_v4 }
 0x2c5   :  { %v765_v11 = vadd.f32 %v1364_v8, %v1725_v38  ;;  %v756_v12 = vpop.f32.mrb[17].mxu0  ;;  %v869_v13 = vpack.c.bf16 %v1811_v7, %v1807_v5 }
 0x2c6   :  { %v757_v14 = vadd.f32 %v1725_v38, %v756_v12  ;;  %v1365_v15 = vpop.f32.mrb[18].mxu0 }
 0x2c7   :  { %1452 = vtanh.f32 %v765_v11  ;;  %v768_v16 = vadd.f32 %v1365_v15, %v1725_v38  ;;  %v759_v17 = vpop.f32.mrb[19].mxu0  ;;  %v895_v55 = vsel %vm142_vm2, %v869_v13, 0 }
 0x2c8   :  { %1454 = vtanh.f32 %v757_v14  ;;  %v760_v18 = vadd.f32 %v1725_v38, %v759_v17 }
 0x2c9   :  { %v1821_v19 = vpop.eup %1444  ;;  %1456 = vtanh.f32 %v768_v16 }
 0x2ca   :  { %v1823_v20 = vpop.eup %1446  ;;  %1458 = vtanh.f32 %v760_v18 }
 0x2cb   :  { %v1825_v21 = vpop.eup %1448 }
 0x2cc   :  { %v1827_v22 = vpop.eup %1450  ;;  %v1368_v23 = vpop.f32.mrb[20].mxu0  ;;  %v872_v24 = vpack.c.bf16 %v1825_v21, %v1821_v19 }
 0x2cd   :  { %v781_v25 = vadd.f32 %v1368_v23, %v1725_v38  ;;  %v772_v26 = vpop.f32.mrb[21].mxu0  ;;  %v871_v27 = vpack.c.bf16 %v1827_v22, %v1823_v20 }
 0x2ce   :  { %v773_v28 = vadd.f32 %v1725_v38, %v772_v26  ;;  %v1369_v29 = vpop.f32.mrb[22].mxu0  ;;  %v892_v26 = vsel %vm142_vm2, %v868_v58, 0  ;;  %v904_v7 = vsel %vm142_vm2, %v872_v24, 0 }
 0x2cf   :  { %1460 = vtanh.f32 %v781_v25  ;;  %v784_v30 = vadd.f32 %v1369_v29, %v1725_v38  ;;  %v775_v31 = vpop.f32.mrb[23].mxu0  ;;  %v901_v5 = vsel %vm142_vm2, %v871_v27, 0  ;;  %v1553_v27 = vmov 0  }
 0x2d0   :  { %1462 = vtanh.f32 %v773_v28  ;;  %v776_v32 = vadd.f32 %v1725_v38, %v775_v31  ;;  %1396 = vset.pattern.permute.xlu0 %v1553_v27  ;;  %1397 = vset.pattern.permute.xlu1 %v1553_v27 }
 0x2d1   :  { %v1837_v33 = vpop.eup %1452  ;;  %1464 = vtanh.f32 %v784_v30 }
 0x2d2   :  { %v1839_v34 = vpop.eup %1454  ;;  %1466 = vtanh.f32 %v776_v32 }
 0x2d3   :  { %v1841_v35 = vpop.eup %1456 }
 0x2d4   :  { %v1843_v37 = vpop.eup %1458  ;;  %v1372_v39 = vpop.f32.mrb[24].mxu0  ;;  %v874_v40 = vpack.c.bf16 %v1841_v35, %v1837_v33 }
 0x2d5   :  { %v797_v9 = vadd.f32 %v1372_v39, %v1725_v38  ;;  %v788_v41 = vpop.f32.mrb[25].mxu0  ;;  %v873_v42 = vpack.c.bf16 %v1843_v37, %v1839_v34 }
 0x2d6   :  { %v789_v43 = vadd.f32 %v1725_v38, %v788_v41  ;;  %v1373_v44 = vpop.f32.mrb[26].mxu0  ;;  %v910_v6 = vsel %vm142_vm2, %v874_v40, 0 }
 0x2d7   :  { %1468 = vtanh.f32 %v797_v9  ;;  %v800_v45 = vadd.f32 %v1373_v44, %v1725_v38  ;;  %v791_v46 = vpop.f32.mrb[27].mxu0  ;;  %v907_v4 = vsel %vm142_vm2, %v873_v42, 0 }
 0x2d8   :  { %1470 = vtanh.f32 %v789_v43  ;;  %v792_v47 = vadd.f32 %v1725_v38, %v791_v46 }
 0x2d9   :  { %v1461_v48 = vpop.eup %1460  ;;  %1472 = vtanh.f32 %v800_v45 }
 0x2da   :  { %v1463_v49 = vpop.eup %1462  ;;  %1474 = vtanh.f32 %v792_v47  ;;  %v898_v47 = vsel %vm142_vm2, %v870_v10, 0  ;;  %v1552_v10 = vmov -inf  }
 0x2db   :  { %v1465_v50 = vpop.eup %1464  ;;  %190 = vst.msk [vmem:[#allocation3] sm:$0xff] %vm189_vm3, %v1552_v10 }
 0x2dc   :  { %v1467_v51 = vpop.eup %1466  ;;  %v876_v52 = vpack.c.bf16 %v1465_v50, %v1461_v48  ;;  %v1376_v57 = vpop.f32.mrb[28].mxu0 }
 0x2dd   :  { %v875_v59 = vpack.c.bf16 %v1467_v51, %v1463_v49  ;;  %v813_v60 = vadd.f32 %v1376_v57, %v1725_v38  ;;  %v804_v62 = vpop.f32.mrb[29].mxu0 }
 0x2de   :  { %v805_v63 = vadd.f32 %v1725_v38, %v804_v62  ;;  %v1377_v0 = vpop.f32.mrb[30].mxu0  ;;  %v1005_v62 = vld [vmem:[#allocation4] sm:$0xff] }
 0x2df   :  { %1382 = vmatprep.subr.msk.bf16.mxu0 %vm142_vm2, %v875_v59  ;;  %1476 = vtanh.f32 %v813_v60  ;;  %v816_v3 = vadd.f32 %v1377_v0, %v1725_v38  ;;  %v807_v8 = vpop.f32.mrb[31].mxu0 }
 0x2e0   :  { %1247 = vmatpush3.bf16.xpose.msra.mxu0 %v889_v2  ;;  %1478 = vtanh.f32 %v805_v63  ;;  %v808_v11 = vadd.f32 %v1725_v38, %v807_v8 }
 0x2e1   :  { %v1469_v12 = vpop.eup %1468  ;;  %1383 = vmatprep.subr.msk.bf16.mxu0 %vm142_vm2, %v876_v52  ;;  %1480 = vtanh.f32 %v816_v3 }
 0x2e2   :  { %v1471_v14 = vpop.eup %1470  ;;  %1482 = vtanh.f32 %v808_v11  ;;  %v986_v33 = vld [vmem:[#allocation3] sm:$0xff] }
 0x2e3   :  { %v1473_v15 = vpop.eup %1472 }
 0x2e4   :  { %v1475_v16 = vpop.eup %1474  ;;  %v878_v17 = vpack.c.bf16 %v1473_v15, %v1469_v12  ;;  %v1380_v54 = vpop.f32.mrb[32].mxu0 }
 0x2e5   :  { %v877_v56 = vpack.c.bf16 %v1475_v16, %v1471_v14  ;;  %v829_v61 = vadd.f32 %v1380_v54, %v1725_v38  ;;  %v820_v18 = vpop.f32.mrb[33].mxu0 }
 0x2e6   :  { %v821_v23 = vadd.f32 %v1725_v38, %v820_v18  ;;  %v1381_v25 = vpop.f32.mrb[34].mxu0 }
 0x2e7   :  { %1484 = vtanh.f32 %v829_v61  ;;  %v832_v28 = vadd.f32 %v1381_v25, %v1725_v38  ;;  %v823_v29 = vpop.f32.mrb[35].mxu0 }
 0x2e8   :  { %1249 = vmatpush3.bf16.xpose.msra.mxu0 %v892_v26  ;;  %1486 = vtanh.f32 %v821_v23  ;;  %v824_v30 = vadd.f32 %v1725_v38, %v823_v29 }
 0x2e9   :  { %v1477_v31 = vpop.eup %1476  ;;  %1384 = vmatprep.subr.msk.bf16.mxu0 %vm142_vm2, %v877_v56  ;;  %1488 = vtanh.f32 %v832_v28 }
 0x2ea   :  { %v1479_v32 = vpop.eup %1478  ;;  %1490 = vtanh.f32 %v824_v30 }
 0x2eb   :  { %v1481_v39 = vpop.eup %1480 }
 0x2ec   :  { %v1483_v9 = vpop.eup %1482  ;;  %v880_v41 = vpack.c.bf16 %v1481_v39, %v1477_v31 }
 0x2ed   :  { %v879_v53 = vpack.c.bf16 %v1483_v9, %v1479_v32 }
 0x2f0   :  { %1251 = vmatpush3.bf16.xpose.msra.mxu0 %v895_v55 }
 0x2f1   :  { %v1485_v58 = vpop.eup %1484  ;;  %1385 = vmatprep.subr.msk.bf16.mxu0 %vm142_vm2, %v878_v17 }
 0x2f2   :  { %v1487_v38 = vpop.eup %1486 }
 0x2f3   :  { %v1489_v43 = vpop.eup %1488 }
 0x2f4   :  { %v1491_v44 = vpop.eup %1490  ;;  %v882_v45 = vpack.c.bf16 %v1489_v43, %v1485_v58 }
 0x2f5   :  { %v881_v46 = vpack.c.bf16 %v1491_v44, %v1487_v38 }
 0x2f8   :  { %1253 = vmatpush3.bf16.xpose.msra.mxu0 %v898_v47 }
 0x2f9   :  { %1386 = vmatprep.subr.msk.bf16.mxu0 %vm142_vm2, %v879_v53 }
 0x300   :  { %1255 = vmatpush3.bf16.xpose.msra.mxu0 %v901_v5 }
 0x301   :  { %1387 = vmatprep.subr.msk.bf16.mxu0 %vm142_vm2, %v880_v41 }
 0x308   :  { %1257 = vmatpush3.bf16.xpose.msra.mxu0 %v904_v7 }
 0x309   :  { %1388 = vmatprep.subr.msk.bf16.mxu0 %vm142_vm2, %v881_v46 }
 0x310   :  { %1259 = vmatpush3.bf16.xpose.msra.mxu0 %v907_v4 }
 0x311   :  { %1389 = vmatprep.subr.msk.bf16.mxu0 %vm142_vm2, %v882_v45 }
 0x318   :  { %1261 = vmatpush3.bf16.xpose.msra.mxu0 %v910_v6 }
 0x31f   :  { %1263 = vmatmul.mubr.msk.bf16.vlgmr.msra.gmra.mrb[36].mxu0 %vm142_vm2, %v1776_v36 }
 0x3f2   :  { %v970_v13 = vpop.f32.mrb[36].mxu0 }
 0x3f3   :  { %v972_v19 = vpop.f32.mrb[37].mxu0 }
 0x3f4   :  { %v974_v20 = vpop.f32.mrb[38].mxu0  ;;  %v987_v21 = vmax.f32 %v970_v13, %v972_v19  ;;  %v1199_v22 = vpack.c.bf16 %v972_v19, %v970_v13 }
 0x3f5   :  { %v975_v24 = vpop.f32.mrb[39].mxu0 }
 0x3f6   :  { %988 = vmax.xlane.f32.xlu0 %v987_v21  ;;  %985 = vst [vmem:[#allocation6] sm:$0xff] %v1199_v22 }
 0x483   :  { %v989_v36 = vpop.xlane.xlu0 %988 }
 0x484   :  { %v990_v34 = vmax.f32 %v986_v33, %v989_v36 }
 0x486   :  { %v991_v35 = vsub.f32 %v986_v33, %v990_v34  ;;  %1080 = vst.msk [vmem:[#allocation3] sm:$0xff] %vm189_vm3, %v990_v34  ;;  %996 = vperm.xlu0 %1396, %v990_v34  }
 0x488   :  { %v992_v59 = vmul.f32 1.442695, %v991_v35 }
 0x505   :  { %v997_v37 = vpop.permute.xlu0 %996 }
 0x506   :  { %v999_v1 = vsub.f32 %v970_v13, %v997_v37  ;;  %v1000_v40 = vsub.f32 %v972_v19, %v997_v37 }
 0x508   :  { %v1001_v42 = vmul.f32 1.442695, %v999_v1  ;;  %v1003_v48 = vmul.f32 1.442695, %v1000_v40 }
 0x50a   :  { %1492 = vpow2.f32 %v1001_v42 }
 0x50b   :  { %1494 = vpow2.f32 %v1003_v48 }
 0x50c   :  { %1496 = vpow2.f32 %v992_v59 }
 0x514   :  { %v1493_v49 = vpop.eup %1492 }
 0x515   :  { %v1495_v50 = vpop.eup %1494  ;;  %v1020_v51 = vpack.c.bf16 %v1493_v49, %v1493_v49 }
 0x516   :  { %v1021_v52 = vpack.c.bf16 %v1495_v50, %v1495_v50  ;;  %v1007_v57 = vadd.f32 %v1495_v50, %v1493_v49  ;;  %v1497_v60 = vpop.eup %1496 }
 0x517   :  { %v1006_v63 = vmul.f32 %v1497_v60, %v1005_v62 }
 0x518   :  { %1070 = vmatprep.mubr.bf16.mxu1 %v1021_v52  ;;  %1008 = vadd.xlane.f32.xlu1 %v1007_v57 }
 0x519   :  { %1071 = vmatmul.mubr.bf16.vlgmr.msra.gmra.mrb[36].mxu1 %v1020_v51 }
 0x529   :  { %1016 = vperm.xlu1 %1397, %v1497_v60  }
 0x5a5   :  { %v1009_v0 = vpop.xlane.xlu1 %1008 }
 0x5a6   :  { %v1010_v2 = vadd.f32 %v1009_v0, %v1006_v63 }
 0x5a8   :  { %1012 = vst.msk [vmem:[#allocation4] sm:$0xff] %vm189_vm3, %v1010_v2 }
 0x5af   :  { %v1084_v3 = vld [vmem:[#allocation4] sm:$0xff] }
 0x5b0   :  { %1088 = vperm.xlu1 %1397, %v1084_v3   ;;  %1498 = vlog2.f32 %v1084_v3 }
 0x5b1   :  { %1513 = shalt.err (!%p1510_p4)
}
 0x5b2   :  { %s1514_s19 = scalar_lea.hbm %s1944_s6, 128 }
 0x5b3   :  { %p1515_p5 = scmp.ne.s32.totalorder %s1944_s6, %s1514_s19  ;;  %p1518_p6 = scmp.lt.u32.totalorder %s1514_s19, %s1944_s6 }
 0x5b5   :  { %p1520_p7 = pnand %p1518_p6, %p1515_p5 }
 0x5b7   :  { %1523 = shalt.err (!%p1520_p7)
}
 0x5b8   :  { %1108 = dma.vmem_to_hbm [thread:$0]  %s1106_s5, 128, %s1944_s6, [#allocation7]   ;;  %v1094_v12 = vld [vmem:[#allocation3] sm:$0xff]  ;;  %v1013_v15 = vld [vmem:[#allocation5] sm:$0xff]  ;;  %v1017_v16 = vpop.permute.xlu1 %1016 }
 0x5b9   :  { %v1019_v56 = vmul.f32 %v1017_v16, %v1013_v15  ;;  %s1555_s6 = smov [#allocation8]  }
 0x5ba   :  { %v1499_v8 = vpop.eup %1498  ;;  %s1117_s26 = sshll.u32 %s1555_s6, 4  ;;  %s1118_s26 = int_to_ptr.vmem [resolvable:$true] %s1117_s26 }
 0x5bb   :  { %v1096_v11 = vmul.f32 0.6931472, %v1499_v8  ;;  %p1529_p9 = scmp.lt.s32.totalorder %s1118_s26, %s1118_s26 }
 0x5bd   :  { %v1097_v14 = vadd.f32 %v1096_v11, %v1094_v12 }
 0x5bf   :  { %1098 = vst.msk [vmem:[%s1945_s7] sm:$0xff] %vm189_vm3, %v1097_v14  ;;  %s1524_s7 = scalar_lea.vmem %s1118_s26, 128 }
 0x5c0   :  { %p1525_p8 = scmp.ne.s32.totalorder %s1118_s26, %s1524_s7  ;;  %p1530_p10 = scmp.lt.s32.totalorder %s1524_s7, %s1524_s7 }
 0x5c2   :  { %p1531_p11 = por %p1530_p10, %p1529_p9 }
 0x5c4   :  { %p1532_p12 = pnand %p1531_p11, %p1525_p8 }
 0x5ec   :  { %v1280_v17 = vpop.f32.mrb[36].mxu1 }
 0x5ed   :  { %v1281_v54 = vpop.f32.mrb[37].mxu1 }
 0x5ee   :  { %v1282_v61 = vadd.f32 %v1281_v54, %v1280_v17  ;;  %v1283_v18 = vpop.f32.mrb[38].mxu1 }
 0x5ef   :  { %v1284_v23 = vpop.f32.mrb[39].mxu1 }
 0x5f0   :  { %v1078_v25 = vadd.f32 %v1282_v61, %v1019_v56 }
 0x5f2   :  { %1079 = vst.msk [vmem:[#allocation5] sm:$0xff] %vm73_vm1, %v1078_v25 }
 0x5f9   :  { %v1085_v29 = vld [vmem:[#allocation5] sm:$0xff] }
 0x62f   :  { %v1089_v26 = vpop.permute.xlu1 %1088 }
 0x630   :  { %1500 = vrcp.f32 %v1089_v26 }
 0x63a   :  { %v1501_v28 = vpop.eup %1500 }
 0x63b   :  { %v1092_v30 = vmul.f32 %v1501_v28, %v1085_v29 }
 0x63d   :  { %1093 = vst.msk [vmem:[#allocation8] sm:$0xff] %vm73_vm1, %v1092_v30 }
 0x63e   :  { %1535 = shalt.err (!%p1532_p12)
}
 0x63f   :  { %s1536_s29 = scalar_lea.hbm %s1946_s8, 128 }
 0x640   :  { %p1537_p13 = scmp.ne.s32.totalorder %s1946_s8, %s1536_s29  ;;  %p1540_p0 = scmp.lt.u32.totalorder %s1536_s29, %s1946_s8 }
 0x642   :  { %p1542_p1 = pnand %p1540_p0, %p1537_p13 }
 0x644   :  { %1545 = shalt.err (!%p1542_p1)
}
 0x645   :  { %1120 = dma.vmem_to_hbm [thread:$0]  %s1118_s26, 128, %s1946_s8, [#allocation9]  }
 0x646   :  { %1546 = dma.done.wait [#allocation7], 128  }
 0x647   :  { %1547 = vsyncadd [#allocation7], 4294967168 }
 0x648   :  { %1548 = dma.done.wait [#allocation9], 128  }
 0x649   :  { %1549 = vsyncadd [#allocation9], 4294967168 }
 0x64a   :  { %1129 = vsyncpa [#allocation7], 1 }
 0x64b   :  { %1130 = vsyncpa [#allocation9], 1 }

</bundles_post_ra>
